<compile_context>
chip_gen: v7x
topology: tpu7x:2x2x1
jax: 0.10.0
libtpu: 0.0.40
codegen_flags: <defaults>
</compile_context>

<pallas_src>
import functools
import math

import jax
import jax.numpy as jnp
from jax.experimental import pallas as pl
from jax.experimental.pallas import tpu as pltpu

_LANE = 128                 # TPU vreg lane width
_MAX_LANES = 4096           # cap on the lane-dense last dim
_MIN_SPLIT_BYTES = 1 << 20  # tensors >= 1 MiB (padded) get a >= 4-step grid
_MIN_GRID_STEPS = 4


def _identity(x):
    return x


def _round_up(x: int, m: int) -> int:
    return ((x + m - 1) // m) * m


def _sublane_multiple(dtype) -> int:
    # Sub-32-bit dtypes pack along sublanes: 8 rows (4B), 16 (2B), 32 (1B).
    itemsize = jnp.dtype(dtype).itemsize
    return {4: 8, 2: 16, 1: 32}.get(itemsize, 8)


def _target_block_bytes() -> int:
    """Per-chip block-size target, sized to fit the scoped-VMEM default.

    4 live buffers (double-buffered in + out):
      v6e / v7x: 4 MiB blocks -> 16 MiB live  (32 MiB scoped default)
      v5e & older: 2 MiB blocks ->  8 MiB live (16 MiB scoped default)
    """
    try:
        kind = jax.devices()[0].device_kind.lower()
    except Exception:  # pragma: no cover - defensive; default is always safe
        return 2 << 20
    if "v6" in kind or "v7" in kind:
        return 4 << 20
    return 2 << 20


def _pick_lane_width(n_elems: int, last_dim: int) -> int:
    """Pick the lane-dense last dim L for the [n_elems/L, L] view.

    Prefer the largest power-of-two multiple of 128 dividing n_elems; otherwise
    the largest divisor of n_elems <= _MAX_LANES (still much denser than a tiny
    in_dim on the lane axis).
    """
    if n_elems % _LANE == 0:
        lanes = _LANE
        while lanes * 2 <= _MAX_LANES and n_elems % (lanes * 2) == 0:
            lanes *= 2
        return lanes
    best = 1
    d = 1
    while d * d <= n_elems:
        if n_elems % d == 0:
            for cand in (d, n_elems // d):
                if cand <= _MAX_LANES and cand > best:
                    best = cand
        d += 1
    if best == 1 and 1 < last_dim <= _MAX_LANES:
        best = last_dim  # degenerate (prime n_elems): keep in_dim on lanes
    return best


def _pick_tile_rows(n_rows: int, n_lanes: int, dtype) -> int:
    """Rows per block, using the (sublane,128)-padded VMEM footprint."""
    dtype = jnp.dtype(dtype)
    sub = _sublane_multiple(dtype)
    itemsize = dtype.itemsize
    # VMEM stores blocks (sublane, lane)-tiled: the lane axis is padded to 128
    # and the row axis to the sublane multiple -> account for both.
    padded_row_bytes = _round_up(n_lanes, _LANE) * itemsize
    total_padded_bytes = _round_up(n_rows, sub) * padded_row_bytes

    rows = max(sub, (_target_block_bytes() // padded_row_bytes) // sub * sub)

    # Large tensors: force a grid of >= _MIN_GRID_STEPS so the software
    # pipeline overlaps DMA and the "parallel" row axis can shard across both
    # TensorCores on v7x (a 1-step grid leaves one TC idle).
    if total_padded_bytes >= _MIN_SPLIT_BYTES and n_rows > _MIN_GRID_STEPS * sub:
        per_step = _round_up((n_rows + _MIN_GRID_STEPS - 1) // _MIN_GRID_STEPS, sub)
        rows = max(sub, min(rows, per_step))

    if rows >= n_rows:
        return n_rows  # full-extent block dim is always legal
    return rows


def _elementwise_kernel(encode_fn, x_ref, o_ref):
    # Streaming template: a concrete subclass's position-independent
    # elementwise encoding body runs here on the VMEM tile.
    o_ref[...] = encode_fn(x_ref[...]).astype(o_ref.dtype)


def _apply_elementwise_2d(x2d: jax.Array, encode_fn, in_place: bool) -> jax.Array:
    m, l = x2d.shape
    tile_rows = _pick_tile_rows(m, l, x2d.dtype)
    n_bytes = m * l * jnp.dtype(x2d.dtype).itemsize
    return pl.pallas_call(
        functools.partial(_elementwise_kernel, encode_fn),
        out_shape=jax.ShapeDtypeStruct((m, l), x2d.dtype),
        grid_spec=pltpu.PrefetchScalarGridSpec(
            num_scalar_prefetch=0,
            # cdiv grid: ragged last block handled by Pallas (in-bounds writes
            # only) -> no jnp.pad / slice passes through HBM.
            grid=(pl.cdiv(m, tile_rows),),
            in_specs=[pl.BlockSpec((tile_rows, l), lambda i: (i, 0))],
            out_specs=pl.BlockSpec((tile_rows, l), lambda i: (i, 0)),
        ),
        compiler_params=pltpu.CompilerParams(
            # Independent rows; lets v7x shard the grid across both TensorCores.
            dimension_semantics=("parallel",),
        ),
        # Purely memory-bound: tell XLA's scheduler so it can overlap
        # neighboring ops around the custom call.
        cost_estimate=pl.CostEstimate(
            flops=0, transcendentals=0, bytes_accessed=2 * n_bytes
        ),
        # Opt-in only, and only valid for block-local *pointwise* bodies with a
        # donated input; otherwise XLA inserts a defensive copy (extra HBM pass)
        # or a non-pointwise body would read clobbered data.
        input_output_aliases={0: 0} if in_place else {},
    )(x2d)


@functools.partial(jax.jit, static_argnames=("encode_fn", "in_place"))
def _encoding_forward(in_tensor: jax.Array, *, encode_fn, in_place: bool = False):
    """Elementwise encoding over [*bs, in_dim] via one lane-dense Pallas pass."""
    shape = in_tensor.shape
    n_elems = math.prod(shape)
    if n_elems == 0:
        return in_tensor

    lanes = _pick_lane_width(n_elems, shape[-1])
    if n_elems % lanes == 0 and lanes > 1:
        # Lane-dense [M, lanes] view (large multiple of 128 when possible):
        # unmasked full-lane stores, dense DMA rows.  Valid because the body is
        # position-independent elementwise (invariant to the reshape).
        x2d = in_tensor.reshape(n_elems // lanes, lanes)
    else:
        # Degenerate fallback: flatten batch dims, keep in_dim as the
        # (full-extent) lane axis.
        d = shape[-1]
        x2d = in_tensor.reshape(n_elems // d, d)

    out2d = _apply_elementwise_2d(x2d, encode_fn, in_place)
    return out2d.reshape(shape)


class PallasEncoding:
    """JAX/Pallas counterpart of the PyTorch `Encoding` base class.

    The reference `forward` is abstract; the base-class contract is a
    shape-preserving map over the feature axis.  The pure-identity case is
    short-circuited (no kernel launch, no HBM traffic).  Subclasses override
    `_encode_fn` with a position-independent elementwise body, which runs in
    the lane-dense streaming Pallas template above.
    """

    # Override point for subclasses (must be a pointwise, position-independent fn).
    _encode_fn = staticmethod(_identity)

    def __init__(self, in_dim: int, in_place: bool = False,
                 force_kernel: bool = False) -> None:
        if in_dim <= 0:
            raise ValueError("Input dimension should be greater than zero")
        self.in_dim = in_dim
        # Base class: output dimension equals input dimension (identity).
        self.out_dim = in_dim
        self.in_place = in_place
        self.force_kernel = force_kernel

    def set_in_dim(self, in_dim: int) -> None:
        if in_dim <= 0:
            raise ValueError("Input dimension should be greater than zero")
        self.in_dim = in_dim

    def get_out_dim(self) -> int:
        if self.out_dim is None:
            raise ValueError("Output dimension has not been set")
        return self.out_dim

    def __call__(self, in_tensor: jax.Array) -> jax.Array:
        assert in_tensor.shape[-1] == self.in_dim, (
            f"expected last dim {self.in_dim}, got {in_tensor.shape[-1]}"
        )
        encode_fn = self._encode_fn
        if encode_fn is _identity and not self.force_kernel:
            # Base-class identity: no work -> no kernel, zero HBM passes.
            return in_tensor
        return _encoding_forward(
            in_tensor, encode_fn=encode_fn, in_place=self.in_place
        )


if __name__ == "__main__":
    key = jax.random.PRNGKey(0)

    # [*bs, input_dim]: bs = (2, 8), in_dim = 32.
    x = jax.random.normal(key, (2, 8, 32), dtype=jnp.float32)

    # Default base-class path: identity short-circuit (no kernel launch).
    enc = PallasEncoding(in_dim=32)
    y = jax.block_until_ready(enc(x))
    assert y.shape == (2, 8, enc.get_out_dim())
    assert y.dtype == x.dtype
    assert bool(jnp.allclose(y, x))

    # Force the Pallas streaming template (lane-dense path: 512 lanes).
    enc_k = PallasEncoding(in_dim=32, force_kernel=True)
    yk = jax.block_until_ready(enc_k(x))
    assert yk.shape == x.shape and bool(jnp.allclose(yk, x))

    # Fallback layout path: 105 elements (not divisible by 128) -> the largest
    # divisor (105) becomes the lane axis instead of in_dim=7.
    x2 = jax.random.normal(jax.random.PRNGKey(1), (3, 5, 7), dtype=jnp.float32)
    enc2 = PallasEncoding(in_dim=7, force_kernel=True)
    y2 = jax.block_until_ready(enc2(x2))
    assert y2.shape == x2.shape and bool(jnp.allclose(y2, x2))

    # Opt-in in-place (aliased) variant still produces the identity result.
    enc3 = PallasEncoding(in_dim=32, in_place=True, force_kernel=True)
    y3 = jax.block_until_ready(enc3(x))
    assert y3.shape == x.shape and bool(jnp.allclose(y3, x))

    print("KERNEL_OK")
</pallas_src>

<mosaic_0001>
module attributes {stable_mosaic.version = 11 : i64} {
  func.func @_elementwise_kernel(%arg0: i32, %arg1: memref<1x512xf32, #tpu.memory_space<vmem>>, %arg2: memref<1x512xf32, #tpu.memory_space<vmem>>) attributes {dimension_semantics = [#tpu.dimension_semantics<parallel>], iteration_bounds = array<i64: 1>, scalar_prefetch = 0 : i64, scratch_operands = 0 : i64, tpu.core_type = #tpu.core_type<tc>, window_params = [{transform_indices = @transform_0, window_bounds = array<i64: 1, 512>}, {transform_indices = @transform_1, window_bounds = array<i64: 1, 512>}]} {
    %c0 = arith.constant 0 : index
    %c0_0 = arith.constant 0 : index
    %0 = vector.load %arg1[%c0, %c0_0] : memref<1x512xf32, #tpu.memory_space<vmem>>, vector<1x512xf32>
    %c0_1 = arith.constant 0 : index
    %c0_2 = arith.constant 0 : index
    %1 = vector.load %arg2[%c0_1, %c0_2] : memref<1x512xf32, #tpu.memory_space<vmem>>, vector<1x512xf32>
    tpu.vector_store %arg2[%c0_1, %c0_2], %0 {strides = array<i32>} : memref<1x512xf32, #tpu.memory_space<vmem>>, vector<1x512xf32>,
    return
  }
  func.func @transform_0(%arg0: i32) -> (i32, i32) {
    %c0_i32 = arith.constant 0 : i32
    %c0_i32_0 = arith.constant 0 : i32
    return %arg0, %c0_i32 : i32, i32
  }
  func.func @transform_1(%arg0: i32) -> (i32, i32) {
    %c0_i32 = arith.constant 0 : i32
    %c0_i32_0 = arith.constant 0 : i32
    return %arg0, %c0_i32 : i32, i32
  }
}

</mosaic_0001>

<bundles_post_ra>
// kernel: _encoding_forward.1
= control target key start
LH: loop header
LB: loop body
LE: loop exit
PB: predicated region body
PF: predicated region fallthrough
CT: control target
= control target key end

     0   :  { %v9_v0 = vlaneseq  ;;  %s34_s0 = inlined_call_operand.vmem [shape: f32[1,512], index: 0, kind: input, shape index: {}]   ;;  %s35_s1 = inlined_call_operand.vmem [shape: f32[1,512], index: 1, kind: output, shape index: {}]  }
   0x1   :  { %v8_v1 = vld [vmem:[%s34_s0] sm:$0xf] }
   0x2   :  { %vm11_vm0 = vcmp.lt.s32.totalorder %v9_v0, 512 }
   0x3   :  { %13 = vst.msk [vmem:[%s35_s1] sm:$0xf] %vm11_vm0, %v8_v1 }

</bundles_post_ra>
